<compile_context>
chip_gen: v5e
topology: v5e:2x2
jax: 0.10.0
libtpu: 0.0.40
codegen_flags: <defaults>
</compile_context>

<pallas_src>
import jax
import jax.numpy as jnp
from jax.experimental import pallas as pl
from jax.experimental.pallas import tpu as pltpu


def maxmin_kernel(x_ref, o_ref):
    # x_ref / o_ref: (1, 2, S, L).  Indexing the leading "pair" axis selects
    # whole (S, L) slabs -> full, dense vector loads/stores.
    a = x_ref[0, 0]
    b = x_ref[0, 1]
    o_ref[0, 0] = jnp.maximum(a, b)
    o_ref[0, 1] = jnp.minimum(a, b)


def _cdiv(a, b):
    return -(-a // b)


def _vmem_budget():
    """(per-tile byte budget, scoped VMEM limit) derived from this part's VMEM."""
    try:
        cap = pltpu.get_tpu_info().vmem_capacity_bytes
    except Exception:
        cap = 64 * 1024 * 1024  # conservative (v7x-sized) default
    # in + out, double-buffered => 4 live tiles; keep their sum <= cap/4.
    return cap // 16, cap // 2


def _pick_row_tile(rows, n_parallel, dsize, budget_bytes, min_total_blocks=8):
    """Sublane-row tile for the (N, 2, rows, 128) layout: a multiple of 8
    (or the full axis when rows <= 8), sized against the VMEM budget and
    shrunk so multi-TensorCore parts get enough parallel blocks."""
    if rows <= 8:
        return rows
    per_row = 2 * 128 * dsize                      # both halves, one lane row
    tile = min(rows, max(budget_bytes // per_row, 8))
    tile = max((tile // 8) * 8, 8)
    want_row_blocks = _cdiv(min_total_blocks, max(n_parallel, 1))
    while tile > 8 and _cdiv(rows, tile) < want_row_blocks:
        tile = max(((tile // 2) // 8) * 8, 8)
    return tile


def _pick_fallback_tiles(half, hw, dsize, budget_bytes):
    """Tiles for the (N, 2, half, HW) fallback layout (half*HW not 128-aligned).
    HW tile is a multiple of 128 (or the full small axis); half tile is a
    multiple of 8 (or the full axis) so every block satisfies (8,128)."""
    if hw < 128:
        hw_tile = hw
    else:
        lanes = max(((budget_bytes // (2 * max(half, 1) * dsize)) // 128) * 128, 128)
        hw_tile = min(lanes, _cdiv(hw, 128) * 128)
    if half <= 8 or 2 * half * hw_tile * dsize <= budget_bytes:
        half_tile = half
    else:
        half_tile = max(((budget_bytes // (2 * hw_tile * dsize)) // 8) * 8, 8)
    return half_tile, hw_tile


def maxmin(x, axis=1):
    """MaxMin activation along the channel axis (axis=1) of an (N, C, ...) array."""
    assert axis == 1, "this kernel implements the default axis=1 (channel) case"
    assert x.ndim >= 2
    n, c = x.shape[0], x.shape[1]
    assert c % 2 == 0, "channel dim must be even for MaxMin"
    half = c // 2
    hw = 1
    for d in x.shape[2:]:
        hw *= d
    m = half * hw
    dsize = jnp.dtype(x.dtype).itemsize

    tile_budget, vmem_limit = _vmem_budget()
    cost = pl.CostEstimate(
        flops=n * c * hw,
        transcendentals=0,
        bytes_accessed=2 * n * c * hw * dsize,
    )

    if m % 128 == 0:
        # Contiguous-per-half layout: one DMA per half slab, lane/sublane dense.
        rows = m // 128
        x4 = x.reshape(n, 2, rows, 128)
        rows_tile = _pick_row_tile(rows, n, dsize, tile_budget)
        grid = (n, _cdiv(rows, rows_tile))
        spec = pl.BlockSpec((1, 2, rows_tile, 128), lambda i, j: (i, 0, j, 0))
        out4 = pl.pallas_call(
            maxmin_kernel,
            out_shape=jax.ShapeDtypeStruct((n, 2, rows, 128), x.dtype),
            grid=grid,
            in_specs=[spec],
            out_specs=spec,
            cost_estimate=cost,
            compiler_params=pltpu.CompilerParams(
                dimension_semantics=("parallel", "parallel"),
                vmem_limit_bytes=vmem_limit,
            ),
        )(x4)
    else:
        # Unaligned fallback: keep the (half, HW) view but ceil-div tile both
        # axes so blocks stay within the VMEM budget and double-buffered.
        x4 = x.reshape(n, 2, half, hw)
        half_tile, hw_tile = _pick_fallback_tiles(half, hw, dsize, tile_budget)
        grid = (n, _cdiv(half, half_tile), _cdiv(hw, hw_tile))
        spec = pl.BlockSpec((1, 2, half_tile, hw_tile), lambda i, j, k: (i, 0, j, k))
        out4 = pl.pallas_call(
            maxmin_kernel,
            out_shape=jax.ShapeDtypeStruct((n, 2, half, hw), x.dtype),
            grid=grid,
            in_specs=[spec],
            out_specs=spec,
            cost_estimate=cost,
            compiler_params=pltpu.CompilerParams(
                dimension_semantics=("parallel", "parallel", "parallel"),
                vmem_limit_bytes=vmem_limit,
            ),
        )(x4)

    return out4.reshape(x.shape)


def maxmin_ref(x, axis=1):
    half = x.shape[axis] // 2
    a = jax.lax.slice_in_dim(x, 0, half, axis=axis)
    b = jax.lax.slice_in_dim(x, half, 2 * half, axis=axis)
    return jnp.concatenate([jnp.maximum(a, b), jnp.minimum(a, b)], axis=axis)


if __name__ == "__main__":
    key = jax.random.PRNGKey(0)

    # Primary (128-aligned) path: NCHW feature map.
    x = jax.random.normal(key, (2, 4, 16, 16), dtype=jnp.float32)
    out = jax.block_until_ready(maxmin(x))
    assert out.shape == x.shape
    assert jnp.allclose(out, maxmin_ref(x)), "Pallas MaxMin does not match reference"

    # Fallback (non-128-aligned) path: odd spatial map.
    k2 = jax.random.PRNGKey(0)
    y = jax.random.normal(k2, (2, 6, 7, 7), dtype=jnp.float32)
    out_y = jax.block_until_ready(maxmin(y))
    assert out_y.shape == y.shape
    assert jnp.allclose(out_y, maxmin_ref(y)), "Pallas MaxMin (fallback) mismatch"

    print("KERNEL_OK")
</pallas_src>

<mosaic_0001>
module attributes {stable_mosaic.version = 11 : i64} {
  func.func @maxmin_kernel(%arg0: i32, %arg1: i32, %arg2: memref<1x2x4x128xf32, #tpu.memory_space<vmem>>, %arg3: memref<1x2x4x128xf32, #tpu.memory_space<vmem>>) attributes {dimension_semantics = [#tpu.dimension_semantics<parallel>, #tpu.dimension_semantics<parallel>], iteration_bounds = array<i64: 2, 1>, scalar_prefetch = 0 : i64, scratch_operands = 0 : i64, tpu.core_type = #tpu.core_type<tc>, window_params = [{transform_indices = @transform_0, window_bounds = array<i64: 1, 2, 4, 128>}, {transform_indices = @transform_1, window_bounds = array<i64: 1, 2, 4, 128>}]} {
    %c0 = arith.constant 0 : index
    %c0_0 = arith.constant 0 : index
    %c0_1 = arith.constant 0 : index
    %c0_2 = arith.constant 0 : index
    %0 = vector.load %arg2[%c0, %c0_0, %c0_1, %c0_2] : memref<1x2x4x128xf32, #tpu.memory_space<vmem>>, vector<1x1x4x128xf32>
    %1 = vector.shape_cast %0 : vector<1x1x4x128xf32> to vector<4x128xf32>
    %c0_3 = arith.constant 0 : index
    %c1 = arith.constant 1 : index
    %c0_4 = arith.constant 0 : index
    %c0_5 = arith.constant 0 : index
    %2 = vector.load %arg2[%c0_3, %c1, %c0_4, %c0_5] : memref<1x2x4x128xf32, #tpu.memory_space<vmem>>, vector<1x1x4x128xf32>
    %3 = vector.shape_cast %2 : vector<1x1x4x128xf32> to vector<4x128xf32>
    %4 = arith.maximumf %1, %3 : vector<4x128xf32>
    %c0_6 = arith.constant 0 : index
    %c0_7 = arith.constant 0 : index
    %c0_8 = arith.constant 0 : index
    %c0_9 = arith.constant 0 : index
    %5 = vector.load %arg3[%c0_6, %c0_7, %c0_8, %c0_9] : memref<1x2x4x128xf32, #tpu.memory_space<vmem>>, vector<1x1x4x128xf32>
    %6 = vector.shape_cast %5 : vector<1x1x4x128xf32> to vector<4x128xf32>
    %7 = vector.shape_cast %4 : vector<4x128xf32> to vector<1x1x4x128xf32>
    tpu.vector_store %arg3[%c0_6, %c0_7, %c0_8, %c0_9], %7 {strides = array<i32>} : memref<1x2x4x128xf32, #tpu.memory_space<vmem>>, vector<1x1x4x128xf32>,
    %8 = arith.minimumf %1, %3 : vector<4x128xf32>
    %c0_10 = arith.constant 0 : index
    %c1_11 = arith.constant 1 : index
    %c0_12 = arith.constant 0 : index
    %c0_13 = arith.constant 0 : index
    %9 = vector.load %arg3[%c0_10, %c1_11, %c0_12, %c0_13] : memref<1x2x4x128xf32, #tpu.memory_space<vmem>>, vector<1x1x4x128xf32>
    %10 = vector.shape_cast %9 : vector<1x1x4x128xf32> to vector<4x128xf32>
    %11 = vector.shape_cast %8 : vector<4x128xf32> to vector<1x1x4x128xf32>
    tpu.vector_store %arg3[%c0_10, %c1_11, %c0_12, %c0_13], %11 {strides = array<i32>} : memref<1x2x4x128xf32, #tpu.memory_space<vmem>>, vector<1x1x4x128xf32>,
    return
  }
  func.func @transform_0(%arg0: i32, %arg1: i32) -> (i32, i32, i32, i32) {
    %c0_i32 = arith.constant 0 : i32
    %c0_i32_0 = arith.constant 0 : i32
    %c0_i32_1 = arith.constant 0 : i32
    return %arg0, %c0_i32, %arg1, %c0_i32_0 : i32, i32, i32, i32
  }
  func.func @transform_1(%arg0: i32, %arg1: i32) -> (i32, i32, i32, i32) {
    %c0_i32 = arith.constant 0 : i32
    %c0_i32_0 = arith.constant 0 : i32
    %c0_i32_1 = arith.constant 0 : i32
    return %arg0, %c0_i32, %arg1, %c0_i32_0 : i32, i32, i32, i32
  }
}

</mosaic_0001>

<bundles_post_ra>
// kernel: tpu_custom_call.1
= control target key start
LH: loop header
LB: loop body
LE: loop exit
PB: predicated region body
PF: predicated region fallthrough
CT: control target
= control target key end

     0   :  { %6 = vsyncpa [#allocation3], 0  ;;  %s597_s0 = inlined_call_operand.hbm [shape: f32[2,2,4,128], index: 0, kind: input, shape index: {}]   ;;  %s598_s1 = inlined_call_operand.hbm [shape: f32[2,2,4,128], index: 1, kind: output, shape index: {}]  }
   0x1   :  { %8 = vsyncpa [#allocation3 + $0x1], 0 }
   0x2   :  { %9 = vsyncpa [#allocation4], 0 }
   0x3   :  { %11 = vsyncpa [#allocation4 + $0x1], 0  ;;  %s477_s6 = smov 0   ;;  %s479_s7 = smov 0  }
   0x4   :  { %s481_s8 = smov 0   ;;  %s483_s9 = smov 0  }
   0x5   :  { %s485_s10 = smov 0   ;;  %s487_s11 = smov 0  }
   0x6 LB: > { %s264_s12 = sadd.s32 4294967295, %s461_s11   ;;  %s265_s13 = sadd.s32 4294967294, %s461_s11   ;;  %s461_s11 = sphi %s487_s11, %s17_s11   ;;  %s457_s10 = sphi %s485_s10, %s607_s10   ;;  %s453_s9 = sphi %s483_s9, %s606_s9   ;;  %s449_s8 = sphi %s481_s8, %s605_s8   ;;  %s445_s7 = sphi %s479_s7, %s604_s7   ;;  %s441_s6 = sphi %s477_s6, %s603_s6  }
   0x7   : > { %s29_s14 = sadd.s32 1, %s457_s10  ;;  %s38_s15 = sadd.s32 1, %s449_s8 }
   0x8   : > { %p31_p0 = scmp.ge.s32.totalorder %s29_s14, 2  ;;  %p45_p1 = scmp.ne.s32.totalorder %s449_s8, %s445_s7 }
   0x9   : > { %p46_p2 = scmp.eq.s32.totalorder %s461_s11, 0  ;;  %p51_p3 = scmp.ne.s32.totalorder %s445_s7, %s441_s6 }
   0xa   : > { %s609_s14 = smov (%p31_p0, %s29_s14), 0  ;;  %p52_p5 = scmp.eq.s32.totalorder %s264_s12, 0 }
   0xb   : > { %p518_p4 = por %p46_p2, %p45_p1  ;;  %s33_s17 = ssub.s32 %s457_s10, %s609_s14 }
   0xc   : > { %p77_p6 = scmp.eq.s32.totalorder %s264_s12, 1  ;;  %p36_p7 = scmp.eq.s32.totalorder %s33_s17, 0 }
   0xd   : > { %p524_p8 = por %p52_p5, %p51_p3  ;;  %p83_p10 = scmp.eq.s32.totalorder %s265_s13, 1 }
   0xe   : > { %p528_p9 = por %p77_p6, %p45_p1  ;;  %p267_p12 = scmp.ge.s32.totalorder %s461_s11, 2 }
   0xf   : > { %s533_s20 = scalar_select %p36_p7, %s449_s8, %s38_s15  }
  0x10   : > { %p535_p11 = por %p83_p10, %p51_p3  ;;  %p295_p13 = scmp.lt.s32.totalorder %s461_s11, 2 }
  0x11   : > { %s103_s22 = sand.u32 1, %s449_s8   ;;  %s281_s24 = sshll.u32 %s457_s10, 3 }
  0x12   : > { %s268_s23 = sshll.u32 %s103_s22, 3  ;;  %s113_s27 = scalar_lea.hbm %s597_s0, %s281_s24 }
  0x13   : > { %s107_s28 = scalar_lea.vmem [#allocation2], %s268_s23  ;;  %s114_s30 = sshll.u32 %s113_s27, 4  ;;  %s115_s30 = int_to_ptr.hbm [resolvable:$true] %s114_s30 }
  0x14   : > { %s116_s29 = sshll.u32 %s107_s28, 4  ;;  %p288_p0 = pnand %p295_p13, %p518_p4  ;;  %s117_s29 = int_to_ptr.vmem [resolvable:$true] %s116_s29 }
  0x15   : > { %p271_p1 = scmp.ge.s32.totalorder %s461_s11, 1  ;;  %s104_s2 = scalar_lea.sflag [#allocation3], %s103_s22 }
  0x16   : > { %s463_s3 = smov 64   ;;  %s464_s4 = smov 4  }
  0x17   : > { %290 = dma.hbm_to_vmem [thread:$0]  (!%p288_p0), %s115_s30, 128, %s117_s29, %s104_s2, %s463_s3, %s463_s3, %s464_s4  }
  0x18   : > { %p124_p2 = scmp.lt.s32.totalorder %s461_s11, 3 }
  0x1a   : > { %p125_p3 = pnand %p271_p1, %p124_p2 }
  0x1b   : > { %s551_s5 = sand.u32 (!%p125_p3), 1, %s445_s7  }
  0x1c   : > { %128 = sbr.rel (%p125_p3) target bundleno = 50 (0x32), region = 24  ;;  %s272_s12 = sshll.u32 (!%p125_p3), %s551_s5, 3 }
  0x1d   : > { %s131_s13 = scalar_lea.sflag (!%p125_p3), [#allocation3], %s551_s5  ;;  %s134_s15 = scalar_lea.vmem (!%p125_p3), [#allocation2], %s272_s12 }
  0x21   : > { %432 = dma.done.wait (%p524_p8), %s131_s13, 128  }
  0x22   : > { %434 = vsyncadd (%p524_p8), %s131_s13, 4294967168  ;;  %s282_s16 = sshll.u32 %s453_s9, 3  ;;  %s153_s24 = scalar_lea.vmem [#allocation5], %s272_s12  ;;  %v154_v0 = vld [vmem:[%s134_s15] sm:$0xf] }
  0x23   : > { %s175_s23 = scalar_lea.hbm %s598_s1, %s282_s16  ;;  %s176_s25 = sshll.u32 %s153_s24, 4  ;;  %v274_v1 = vld [vmem:[%s134_s15 + $0x4] sm:$0xf]  ;;  %s177_s25 = int_to_ptr.vmem [resolvable:$true] %s176_s25 }
  0x24   : > { %s178_s26 = sshll.u32 %s175_s23, 4  ;;  %v157_v2 = vmax.f32 %v154_v0, %v274_v1  ;;  %v159_v3 = vmin.f32 %v154_v0, %v274_v1  ;;  %s163_s18 = scalar_lea.sflag [#allocation4], %s551_s5  ;;  %s179_s26 = int_to_ptr.hbm [resolvable:$true] %s178_s26 }
  0x25   : > { %s393_s27 = sshra.s32 %s179_s26, 4  ;;  %s399_s30 = scalar_lea.hbm %s598_s1, 16  ;;  %s394_s27 = int_to_ptr.hbm [resolvable:$true] %s393_s27 }
  0x26   : > { %158 = vst [vmem:[%s153_s24] sm:$0xf] %v157_v2  ;;  %s395_s9 = scalar_lea.hbm %s394_s27, 8  ;;  %p400_p7 = scmp.lt.s32.totalorder %s394_s27, %s598_s1 }
  0x27   : > { %275 = vst [vmem:[%s153_s24 + $0x4] sm:$0xf] %v159_v3  ;;  %p396_p4 = scmp.ne.s32.totalorder %s394_s27, %s395_s9  ;;  %p401_p8 = scmp.lt.s32.totalorder %s399_s30, %s395_s9 }
  0x29   : > { %p397_p5 = pnand %p396_p4, %p528_p9  ;;  %p402_p10 = por %p401_p8, %p400_p7 }
  0x2b   : > { %p398_p6 = pneg %p397_p5 }
  0x2d   : > { %p403_p13 = pnand %p402_p10, %p398_p6 }
  0x2f   : > { %406 = shalt.err (!%p403_p13)
}
  0x30   : > { %s465_s4 = smov 64   ;;  %s466_s5 = smov 4  }
  0x31   : > { %285 = dma.vmem_to_hbm [thread:$0]  (%p528_p9), %s177_s25, 128, %s179_s26, %s163_s18, %s465_s4, %s465_s4, %s466_s5  }
  0x32 PF: > { %s193_s12 = sand.u32 1, %s441_s6   ;;  %p292_p0 = pnand %p267_p12, %p535_p11 }
  0x33   : > { %s194_s13 = scalar_lea.sflag [#allocation4], %s193_s12 }
  0x34   : > { %p293_p1 = pneg %p292_p0 }
  0x36   : > { %436 = dma.done.wait (%p293_p1), %s194_s13, 128  }
  0x37   : > { %438 = vsyncadd (%p293_p1), %s194_s13, 4294967168  ;;  %s17_s11 = sadd.s32 1, %s461_s11   ;;  %s603_s6 = smov %s445_s7 }
  0x38   : > { %p14_p2 = scmp.ge.s32.totalorder %s17_s11, 4   ;;  %s604_s7 = smov %s449_s8 }
  0x39   : > { %s605_s8 = smov %s533_s20  ;;  %s606_s9 = smov %s457_s10 }
  0x3a   : > { %s607_s10 = smov %s609_s14  ;;  %16 = sbr.rel (!%p14_p2) target bundleno = 6 (0x6), region = 71 }
  0x3f   :  { %200 = vsyncpa [#allocation3], 1 }
  0x40   :  { %202 = vsyncpa [#allocation3 + $0x1], 1 }
  0x41   :  { %203 = vsyncpa [#allocation4], 1 }
  0x42   :  { %205 = vsyncpa [#allocation4 + $0x1], 1 }

</bundles_post_ra>
